<compile_context>
chip_gen: v5e
topology: v5e:2x2
jax: 0.10.0
libtpu: 0.0.40
codegen_flags: <defaults>
</compile_context>

<pallas_src>
import functools

import jax
import jax.numpy as jnp
from jax.experimental import pallas as pl
from jax.experimental.pallas import tpu as pltpu


def _round_up(x: int, m: int) -> int:
    return ((x + m - 1) // m) * m


def _batch_tiling(batch: int, max_tile: int = 4096):
    """Pick (tile_b, padded_batch) minimizing padding while keeping tiles large."""
    if batch <= max_tile:
        # Zero-padding-free 2-way split when it is free (keeps both v7x TCs busy).
        if batch >= 64 and batch % 16 == 0:
            return batch // 2, batch
        # Single tile; block == full batch extent is always a legal block shape.
        return batch, batch
    n_tiles = pl.cdiv(batch, max_tile)
    tile_b = _round_up(pl.cdiv(batch, n_tiles), 8)
    return tile_b, _round_up(batch, tile_b)


def _ae_kernel(x_ref, w1_ref, b1_ref, w2_ref, b2_ref, lat_ref, out_ref):
    # x_ref:   (TB, d_in)    flattened input tile
    # w1_ref:  (d_in, d_lat) encoder weight, pre-transposed -> plain (M,K)x(K,N)
    # b1_ref:  (1, d_lat)
    # w2_ref:  (d_lat, d_in) decoder weight, pre-transposed
    # b2_ref:  (1, d_in)
    # lat_ref: (TB, d_lat)   latent output tile
    # out_ref: (TB, d_in)    reconstruction output tile (flat)
    x = x_ref[...]
    h = jnp.dot(x, w1_ref[...], preferred_element_type=jnp.float32) + b1_ref[...]
    latent = jnp.tanh(h)
    lat_ref[...] = latent.astype(lat_ref.dtype)

    y = jnp.dot(latent, w2_ref[...], preferred_element_type=jnp.float32) + b2_ref[...]
    out_ref[...] = jnp.tanh(y).astype(out_ref.dtype)


@functools.partial(jax.jit, static_argnames=("channel", "input_size"))
def autoencoder_forward(x, w_en, b_en, w_de, b_de, channel, input_size):
    """x: (B, channel, input_size) float32.
    w_en: (latent, channel*input_size), b_en: (latent,)      -- PyTorch Linear layout
    w_de: (channel*input_size, latent), b_de: (channel*input_size,)
    Returns (recon (B, channel, input_size), latent (B, latent))."""
    B = x.shape[0]
    d_in = channel * input_size
    d_lat = w_en.shape[0]

    tile_b, B_p = _batch_tiling(B)
    grid = (B_p // tile_b,)

    x_flat = x.reshape(B, d_in)
    if B_p != B:
        x_flat = jnp.pad(x_flat, ((0, B_p - B), (0, 0)))

    # One-time tiny host-side transposes; kernel then runs plain row-major matmuls.
    w1t = w_en.T            # (d_in, d_lat)
    w2t = w_de.T            # (d_lat, d_in)
    b1 = b_en.reshape(1, d_lat)
    b2 = b_de.reshape(1, d_in)

    flops = 2 * 2 * B_p * d_in * d_lat
    transcendentals = B_p * (d_in + d_lat)
    bytes_accessed = 4 * (
        B_p * d_in                      # x read
        + w1t.size + b1.size + w2t.size + b2.size
        + B_p * d_lat + B_p * d_in      # latent + recon writes
    )

    latent, recon_flat = pl.pallas_call(
        _ae_kernel,
        out_shape=(
            jax.ShapeDtypeStruct((B_p, d_lat), x.dtype),   # latent
            jax.ShapeDtypeStruct((B_p, d_in), x.dtype),    # reconstruction (flat)
        ),
        grid=grid,
        in_specs=[
            pl.BlockSpec((tile_b, d_in), lambda i: (i, 0)),   # x tile (pipelined)
            pl.BlockSpec((d_in, d_lat), lambda i: (0, 0)),    # w_en^T (VMEM-resident)
            pl.BlockSpec((1, d_lat), lambda i: (0, 0)),       # b_en
            pl.BlockSpec((d_lat, d_in), lambda i: (0, 0)),    # w_de^T
            pl.BlockSpec((1, d_in), lambda i: (0, 0)),        # b_de
        ],
        out_specs=(
            pl.BlockSpec((tile_b, d_lat), lambda i: (i, 0)),
            pl.BlockSpec((tile_b, d_in), lambda i: (i, 0)),
        ),
        compiler_params=pltpu.CompilerParams(
            dimension_semantics=("parallel",),
        ),
        cost_estimate=pl.CostEstimate(
            flops=flops,
            transcendentals=transcendentals,
            bytes_accessed=bytes_accessed,
        ),
    )(x_flat, w1t, b1, w2t, b2)

    if B_p != B:
        latent = latent[:B]
        recon_flat = recon_flat[:B]
    recon = recon_flat.reshape(B, channel, input_size)
    return recon, latent


if __name__ == "__main__":
    # Small shapes consistent with the module: batch=2, channel=4, input_size=16, latent=32
    B, C, L, LAT = 2, 4, 16, 32
    D_IN = C * L

    key = jax.random.PRNGKey(0)
    kx, k1, k2, k3, k4 = jax.random.split(key, 5)

    x = jax.random.normal(kx, (B, C, L), dtype=jnp.float32)

    # Deterministic nn.Linear-style init: U(-1/sqrt(fan_in), 1/sqrt(fan_in))
    bound_en = 1.0 / (D_IN ** 0.5)
    w_en = jax.random.uniform(k1, (LAT, D_IN), minval=-bound_en, maxval=bound_en, dtype=jnp.float32)
    b_en = jax.random.uniform(k2, (LAT,), minval=-bound_en, maxval=bound_en, dtype=jnp.float32)

    bound_de = 1.0 / (LAT ** 0.5)
    w_de = jax.random.uniform(k3, (D_IN, LAT), minval=-bound_de, maxval=bound_de, dtype=jnp.float32)
    b_de = jax.random.uniform(k4, (D_IN,), minval=-bound_de, maxval=bound_de, dtype=jnp.float32)

    recon, latent = autoencoder_forward(x, w_en, b_en, w_de, b_de, C, L)
    jax.block_until_ready((recon, latent))

    # Reference check in plain JAX (same math as the PyTorch forward)
    x_flat = x.reshape(B, -1)
    lat_ref = jnp.tanh(x_flat @ w_en.T + b_en)
    rec_ref = jnp.tanh(lat_ref @ w_de.T + b_de).reshape(B, C, L)

    assert recon.shape == (B, C, L) and latent.shape == (B, LAT)
    assert jnp.allclose(recon, rec_ref, atol=1e-5), "recon mismatch"
    assert jnp.allclose(latent, lat_ref, atol=1e-5), "latent mismatch"

    print("KERNEL_OK")
</pallas_src>

<mosaic_0001>
module attributes {stable_mosaic.version = 11 : i64} {
  func.func @_ae_kernel(%arg0: i32, %arg1: memref<2x64xf32, #tpu.memory_space<vmem>>, %arg2: memref<64x32xf32, #tpu.memory_space<vmem>>, %arg3: memref<1x32xf32, #tpu.memory_space<vmem>>, %arg4: memref<32x64xf32, #tpu.memory_space<vmem>>, %arg5: memref<1x64xf32, #tpu.memory_space<vmem>>, %arg6: memref<2x32xf32, #tpu.memory_space<vmem>>, %arg7: memref<2x64xf32, #tpu.memory_space<vmem>>) attributes {dimension_semantics = [#tpu.dimension_semantics<parallel>], iteration_bounds = array<i64: 1>, scalar_prefetch = 0 : i64, scratch_operands = 0 : i64, tpu.core_type = #tpu.core_type<tc>, window_params = [{transform_indices = @transform_0, window_bounds = array<i64: 2, 64>}, {pipeline_mode = #tpu.pipeline_mode<synchronous>, transform_indices = @transform_1, window_bounds = array<i64: 64, 32>}, {pipeline_mode = #tpu.pipeline_mode<synchronous>, transform_indices = @transform_2, window_bounds = array<i64: 1, 32>}, {pipeline_mode = #tpu.pipeline_mode<synchronous>, transform_indices = @transform_3, window_bounds = array<i64: 32, 64>}, {pipeline_mode = #tpu.pipeline_mode<synchronous>, transform_indices = @transform_4, window_bounds = array<i64: 1, 64>}, {transform_indices = @transform_5, window_bounds = array<i64: 2, 32>}, {transform_indices = @transform_6, window_bounds = array<i64: 2, 64>}]} {
    %c0 = arith.constant 0 : index
    %c0_0 = arith.constant 0 : index
    %0 = vector.load %arg1[%c0, %c0_0] : memref<2x64xf32, #tpu.memory_space<vmem>>, vector<2x64xf32>
    %c0_1 = arith.constant 0 : index
    %c0_2 = arith.constant 0 : index
    %1 = vector.load %arg2[%c0_1, %c0_2] : memref<64x32xf32, #tpu.memory_space<vmem>>, vector<64x32xf32>
    %cst = arith.constant dense<0.000000e+00> : vector<2x32xf32>
    %2 = tpu.matmul %0, %1, %cst {dimension_numbers = #tpu.dot_dimension_numbers<[1], [0], [0], [1], [0, 0, 1, 1], [], []>} : vector<2x64xf32>, vector<64x32xf32>, vector<2x32xf32> -> vector<2x32xf32>
    %c0_3 = arith.constant 0 : index
    %c0_4 = arith.constant 0 : index
    %3 = vector.load %arg3[%c0_3, %c0_4] : memref<1x32xf32, #tpu.memory_space<vmem>>, vector<1x32xf32>
    %4 = vector.broadcast %3 : vector<1x32xf32> to vector<2x32xf32>
    %5 = arith.addf %2, %4 : vector<2x32xf32>
    %6 = math.tanh %5 : vector<2x32xf32>
    %c0_5 = arith.constant 0 : index
    %c0_6 = arith.constant 0 : index
    %7 = vector.load %arg6[%c0_5, %c0_6] : memref<2x32xf32, #tpu.memory_space<vmem>>, vector<2x32xf32>
    tpu.vector_store %arg6[%c0_5, %c0_6], %6 {strides = array<i32>} : memref<2x32xf32, #tpu.memory_space<vmem>>, vector<2x32xf32>,
    %c0_7 = arith.constant 0 : index
    %c0_8 = arith.constant 0 : index
    %8 = vector.load %arg4[%c0_7, %c0_8] : memref<32x64xf32, #tpu.memory_space<vmem>>, vector<32x64xf32>
    %cst_9 = arith.constant dense<0.000000e+00> : vector<2x64xf32>
    %9 = tpu.matmul %6, %8, %cst_9 {dimension_numbers = #tpu.dot_dimension_numbers<[1], [0], [0], [1], [0, 0, 1, 1], [], []>} : vector<2x32xf32>, vector<32x64xf32>, vector<2x64xf32> -> vector<2x64xf32>
    %c0_10 = arith.constant 0 : index
    %c0_11 = arith.constant 0 : index
    %10 = vector.load %arg5[%c0_10, %c0_11] : memref<1x64xf32, #tpu.memory_space<vmem>>, vector<1x64xf32>
    %11 = vector.broadcast %10 : vector<1x64xf32> to vector<2x64xf32>
    %12 = arith.addf %9, %11 : vector<2x64xf32>
    %13 = math.tanh %12 : vector<2x64xf32>
    %c0_12 = arith.constant 0 : index
    %c0_13 = arith.constant 0 : index
    %14 = vector.load %arg7[%c0_12, %c0_13] : memref<2x64xf32, #tpu.memory_space<vmem>>, vector<2x64xf32>
    tpu.vector_store %arg7[%c0_12, %c0_13], %13 {strides = array<i32>} : memref<2x64xf32, #tpu.memory_space<vmem>>, vector<2x64xf32>,
    return
  }
  func.func @transform_0(%arg0: i32) -> (i32, i32) {
    %c0_i32 = arith.constant 0 : i32
    %c0_i32_0 = arith.constant 0 : i32
    return %arg0, %c0_i32 : i32, i32
  }
  func.func @transform_1(%arg0: i32) -> (i32, i32) {
    %c0_i32 = arith.constant 0 : i32
    %c0_i32_0 = arith.constant 0 : i32
    %c0_i32_1 = arith.constant 0 : i32
    return %c0_i32, %c0_i32_0 : i32, i32
  }
  func.func @transform_2(%arg0: i32) -> (i32, i32) {
    %c0_i32 = arith.constant 0 : i32
    %c0_i32_0 = arith.constant 0 : i32
    %c0_i32_1 = arith.constant 0 : i32
    return %c0_i32, %c0_i32_0 : i32, i32
  }
  func.func @transform_3(%arg0: i32) -> (i32, i32) {
    %c0_i32 = arith.constant 0 : i32
    %c0_i32_0 = arith.constant 0 : i32
    %c0_i32_1 = arith.constant 0 : i32
    return %c0_i32, %c0_i32_0 : i32, i32
  }
  func.func @transform_4(%arg0: i32) -> (i32, i32) {
    %c0_i32 = arith.constant 0 : i32
    %c0_i32_0 = arith.constant 0 : i32
    %c0_i32_1 = arith.constant 0 : i32
    return %c0_i32, %c0_i32_0 : i32, i32
  }
  func.func @transform_5(%arg0: i32) -> (i32, i32) {
    %c0_i32 = arith.constant 0 : i32
    %c0_i32_0 = arith.constant 0 : i32
    return %arg0, %c0_i32 : i32, i32
  }
  func.func @transform_6(%arg0: i32) -> (i32, i32) {
    %c0_i32 = arith.constant 0 : i32
    %c0_i32_0 = arith.constant 0 : i32
    return %arg0, %c0_i32 : i32, i32
  }
}

</mosaic_0001>

<bundles_post_ra>
// kernel: autoencoder_forward.1
= control target key start
LH: loop header
LB: loop body
LE: loop exit
PB: predicated region body
PF: predicated region fallthrough
CT: control target
= control target key end

     0   :  { %s240_s0 = inlined_call_operand.vmem [shape: f32[2,64], index: 0, kind: input, shape index: {}]   ;;  %s241_s1 = inlined_call_operand.vmem [shape: f32[64,32], index: 1, kind: input, shape index: {}]   ;;  %s242_s2 = inlined_call_operand.vmem [shape: f32[1,32], index: 2, kind: input, shape index: {}]   ;;  %s243_s3 = inlined_call_operand.vmem [shape: f32[32,64], index: 3, kind: input, shape index: {}]   ;;  %s244_s4 = inlined_call_operand.vmem [shape: f32[1,64], index: 4, kind: input, shape index: {}]   ;;  %s245_s5 = inlined_call_operand.hbm [shape: f32[2,32], index: 5, kind: output, shape index: {0}]   ;;  %s246_s6 = inlined_call_operand.vmem [shape: f32[2,64], index: 6, kind: output, shape index: {1}]  }
   0x1   :  { %v31_v0 = vld [vmem:[%s241_s1 + $0x38] sm:$0xff]  ;;  %v30_v1 = vld [vmem:[%s241_s1 + $0x30] sm:$0xff]  ;;  %v29_v2 = vld [vmem:[%s241_s1 + $0x28] sm:$0xff] }
   0x2   :  { %48 = vmatpush.msra.mxu0 %v31_v0  ;;  %v28_v3 = vld [vmem:[%s241_s1 + $0x20] sm:$0xff] }
   0x4   :  { %49 = vmatpush.msra.mxu0 %v30_v1 }
   0x5   :  { %12 = vsyncpa [#allocation3], 0  ;;  %v27_v4 = vld [vmem:[%s241_s1 + $0x18] sm:$0xff]  ;;  %v26_v5 = vld [vmem:[%s241_s1 + $0x10] sm:$0xff]  ;;  %vm36_vm0 = vcmask 523264   ;;  %vm71_vm1 = vcmask 261120  }
   0x6   :  { %50 = vmatpush.msra.mxu0 %v29_v2  ;;  %v25_v6 = vld [vmem:[%s241_s1 + $0x8] sm:$0xff]  ;;  %v24_v7 = vld [vmem:[%s241_s1] sm:$0xff]  ;;  %v66_v9 = vld [vmem:[%s243_s3 + $0x18] sm:$0xff]  ;;  %vm61_vm2 = vcmask 254976   ;;  %s153_s23 = smov [#allocation2]   ;;  %vm96_vm3 = vcmask 517120  }
   0x7   :  { %v23_v8 = vld [vmem:[%s240_s0] sm:$0x3]  ;;  %87 = vmatpush.msra.mxu1 %v66_v9  ;;  %v65_v10 = vld [vmem:[%s243_s3 + $0x10] sm:$0xff]  ;;  %v64_v11 = vld [vmem:[%s243_s3 + $0x8] sm:$0xff]  ;;  %s103_s24 = sshll.u32 %s153_s23, 4  ;;  %s104_s24 = int_to_ptr.vmem [resolvable:$true] %s103_s24 }
   0x8   :  { %51 = vmatpush.msra.mxu0 %v28_v3  ;;  %v63_v12 = vld [vmem:[%s243_s3] sm:$0xff]  ;;  %s105_s3 = sshll.u32 %s245_s5, 4  ;;  %s106_s3 = int_to_ptr.hbm [resolvable:$true] %s105_s3 }
   0x9   :  { %88 = vmatpush.msra.mxu1 %v65_v10  ;;  %v121_v13 = vld [vmem:[%s242_s2] ss:$0 sm:$0xff] }
   0xa   :  { %52 = vmatpush.msra.mxu0 %v27_v4  ;;  %v122_v17 = vld [vmem:[%s244_s4] ss:$0 sm:$0xff] }
   0xb   :  { %89 = vmatpush.msra.mxu1 %v64_v11 }
   0xc   :  { %53 = vmatpush.msra.mxu0 %v26_v5 }
   0xd   :  { %90 = vmatpush.msra.mxu1 %v63_v12 }
   0xe   :  { %54 = vmatpush.msra.mxu0 %v25_v6 }
  0x10   :  { %55 = vmatpush.msra.mxu0 %v24_v7 }
  0x11   :  { %118 = vmatmul.msk.f32.vlgmr.msra.gmra.mxu0 %vm36_vm0, %v23_v8 }
  0x8e   :  { %v57_v14 = vpop.f32.mrf.mxu0 }
  0x8f   :  { %v58_v15 = vadd.f32 %v121_v13, %v57_v14 }
  0x91   :  { %123 = vtanh.f32 %v58_v15 }
  0x97   :  { %v124_v16 = vpop.eup %123 }
  0x98   :  { %119 = vmatmul.msk.f32.vlgmr.msra.gmra.mxu1 %vm71_vm1, %v124_v16  ;;  %62 = vst.msk [vmem:[#allocation2] sm:$0x3] %vm61_vm2, %v124_v16 }
  0x99   :  { %108 = dma.vmem_to_hbm [thread:$0]  %s104_s24, 32, %s106_s3, [#allocation3]  }
 0x115   :  { %v92_v18 = vpop.f32.mrf.mxu1 }
 0x116   :  { %v93_v19 = vadd.f32 %v122_v17, %v92_v18 }
 0x118   :  { %125 = vtanh.f32 %v93_v19 }
 0x11e   :  { %v126_v20 = vpop.eup %125 }
 0x11f   :  { %97 = vst.msk [vmem:[%s246_s6] sm:$0x3] %vm96_vm3, %v126_v20 }
 0x120   :  { %151 = dma.done.wait [#allocation3], 32  }
 0x121   :  { %152 = vsyncadd [#allocation3], 4294967264 }
 0x122   :  { %117 = vsyncpa [#allocation3], 1 }

</bundles_post_ra>
